<compile_context>
chip_gen: v7x
topology: tpu7x:2x2x1
jax: 0.10.0
libtpu: 0.0.40
codegen_flags: <defaults>
</compile_context>

<pallas_src>
import jax
import jax.numpy as jnp
from jax import lax
from jax.experimental import pallas as pl
from jax.experimental.pallas import tpu as pltpu

HIDDEN = 64          # per-RNN hidden size
H2 = 2 * HIDDEN      # fused hidden size (sentiment | price)
FC1_OUT = 128
BN_EPS = 1e-5


def rnn_fc_kernel(x_ref, w_ih_ref, b_ref, w_hh_ref, w1_ref, b1_ref, out_ref):
    """Fused two-RNN recurrence + (BN-folded) fc1.

    x_ref   : (T*Bp, Dc)   time-major flattened combined input [sentiment | price]
    w_ih_ref: (Dc, 2H)     block-diagonal input weights (pre-transposed)
    b_ref   : (1, 2H)      combined recurrent bias (b_ih + b_hh, both RNNs)
    w_hh_ref: (2H, 2H)     block-diagonal recurrent weights (pre-transposed)
    w1_ref  : (2H, 128)    fc1 weight with eval-mode BN folded in
    b1_ref  : (1, 128)     fc1 bias with eval-mode BN folded in
    out_ref : (Bp, 128)
    """
    Bp = out_ref.shape[0]
    TB = x_ref.shape[0]
    T = TB // Bp
    H2k = w_hh_ref.shape[0]

    w_hh = w_hh_ref[...]

    # Prologue: input projections for ALL timesteps in one MXU push, plus the
    # recurrent bias (broadcast hoisted; independent of the serial h-chain).
    x_proj = (jnp.dot(x_ref[...], w_ih_ref[...],
                      preferred_element_type=jnp.float32)
              + jnp.broadcast_to(b_ref[...], (TB, H2k)))

    # Fused Elman recurrence: h_t = tanh(x_proj_t + h_{t-1} @ W_hh_block), h_0 = 0.
    # One 128-wide MXU push and one tanh per step.  Static slices of x_proj are
    # sublane-aligned because Bp is a multiple of 8.
    h = jnp.zeros((Bp, H2k), jnp.float32)
    for t in range(T):
        h = jnp.tanh(x_proj[t * Bp:(t + 1) * Bp, :] +
                     jnp.dot(h, w_hh, preferred_element_type=jnp.float32))

    # Epilogue: BN (eval) + dropout (identity) + fc1 collapse into one dot + bias.
    out_ref[...] = (jnp.dot(h, w1_ref[...], preferred_element_type=jnp.float32)
                    + b1_ref[...])


def init_params(key, input_size=(1, 4)):
    """Deterministic synthetic parameters matching the PyTorch module shapes."""
    H = HIDDEN
    ks = list(jax.random.split(key, 18))

    def u(k, shape, bound):
        return jax.random.uniform(k, shape, jnp.float32, -bound, bound)

    s_rnn = 1.0 / float(jnp.sqrt(H))
    s_fc1 = 1.0 / float(jnp.sqrt(2 * H))
    return {
        # nn.RNN(input_size[0], 64)
        "w_ih_s": u(ks[0], (H, input_size[0]), s_rnn),
        "w_hh_s": u(ks[1], (H, H), s_rnn),
        "b_ih_s": u(ks[2], (H,), s_rnn),
        "b_hh_s": u(ks[3], (H,), s_rnn),
        # nn.RNN(input_size[1], 64)
        "w_ih_p": u(ks[4], (H, input_size[1]), s_rnn),
        "w_hh_p": u(ks[5], (H, H), s_rnn),
        "b_ih_p": u(ks[6], (H,), s_rnn),
        "b_hh_p": u(ks[7], (H,), s_rnn),
        # BatchNorm1d(64) x2 (eval-mode running stats, non-trivial values)
        "bn_s_gamma": 1.0 + 0.1 * jax.random.normal(ks[8], (H,), jnp.float32),
        "bn_s_beta": 0.1 * jax.random.normal(ks[9], (H,), jnp.float32),
        "bn_s_mean": 0.1 * jax.random.normal(ks[10], (H,), jnp.float32),
        "bn_s_var": jax.random.uniform(ks[11], (H,), jnp.float32, 0.5, 1.5),
        "bn_p_gamma": 1.0 + 0.1 * jax.random.normal(ks[12], (H,), jnp.float32),
        "bn_p_beta": 0.1 * jax.random.normal(ks[13], (H,), jnp.float32),
        "bn_p_mean": 0.1 * jax.random.normal(ks[14], (H,), jnp.float32),
        "bn_p_var": jax.random.uniform(ks[15], (H,), jnp.float32, 0.5, 1.5),
        # nn.Linear(128, 128)
        "fc1_w": u(ks[16], (FC1_OUT, 2 * H), s_fc1),
        "fc1_b": u(ks[17], (FC1_OUT,), s_fc1),
    }


def _fold_bn(gamma, beta, mean, var):
    scale = gamma * lax.rsqrt(var + BN_EPS)
    shift = beta - mean * scale
    return scale, shift           # 1-D (H,)


def rnn_1_fc_2_forward(sentiment_seq, price_seq, params):
    B, T = sentiment_seq.shape
    Dp = price_seq.shape[-1]
    Dc = 1 + Dp
    H = HIDDEN

    # --- combined time-major input, batch padded to a sublane multiple ---------
    x_comb = jnp.concatenate(
        [sentiment_seq[..., None].astype(jnp.float32),
         price_seq.astype(jnp.float32)], axis=-1)            # (B, T, Dc)
    x_comb = jnp.transpose(x_comb, (1, 0, 2))                # (T, B, Dc)

    Bp = max(8, -(-B // 8) * 8)                              # pad batch to x8
    if Bp != B:
        x_comb = jnp.pad(x_comb, ((0, 0), (0, Bp - B), (0, 0)))
    x_flat = x_comb.reshape(T * Bp, Dc)                      # (T*Bp, Dc)

    # --- block-diagonal fused RNN weights (pre-transposed to x @ W layout) -----
    w_ih = jnp.zeros((Dc, H2), jnp.float32)
    w_ih = w_ih.at[0:1, :H].set(params["w_ih_s"].T)          # sentiment block
    w_ih = w_ih.at[1:, H:].set(params["w_ih_p"].T)           # price block
    w_hh = jnp.zeros((H2, H2), jnp.float32)
    w_hh = w_hh.at[:H, :H].set(params["w_hh_s"].T)
    w_hh = w_hh.at[H:, H:].set(params["w_hh_p"].T)
    b_rnn = jnp.concatenate([params["b_ih_s"] + params["b_hh_s"],
                             params["b_ih_p"] + params["b_hh_p"]]).reshape(1, H2)

    # --- fold eval-mode BatchNorm into fc1 --------------------------------------
    scale_s, shift_s = _fold_bn(params["bn_s_gamma"], params["bn_s_beta"],
                                params["bn_s_mean"], params["bn_s_var"])
    scale_p, shift_p = _fold_bn(params["bn_p_gamma"], params["bn_p_beta"],
                                params["bn_p_mean"], params["bn_p_var"])
    scale = jnp.concatenate([scale_s, scale_p])              # (2H,)
    shift = jnp.concatenate([shift_s, shift_p])              # (2H,)
    w1_t = params["fc1_w"].T                                 # (2H, 128)
    w1_folded = scale[:, None] * w1_t                        # (2H, 128)
    b1_folded = (shift @ w1_t + params["fc1_b"]).reshape(1, FC1_OUT)

    # --- cost hint so XLA schedules around this tiny kernel sensibly -----------
    cost = pl.CostEstimate(
        flops=(2 * T * Bp * H2 * H2            # recurrence
               + 2 * T * Bp * Dc * H2          # input projection
               + 2 * Bp * H2 * FC1_OUT),       # fc1
        transcendentals=T * Bp * H2,
        bytes_accessed=4 * (x_flat.size + w_ih.size + w_hh.size + b_rnn.size
                            + w1_folded.size + b1_folded.size + Bp * FC1_OUT),
    )

    vmem = pl.BlockSpec(memory_space=pltpu.MemorySpace.VMEM)
    out = pl.pallas_call(
        rnn_fc_kernel,
        out_shape=jax.ShapeDtypeStruct((Bp, FC1_OUT), jnp.float32),
        in_specs=[vmem] * 6,
        out_specs=vmem,
        cost_estimate=cost,
    )(x_flat, w_ih, b_rnn, w_hh, w1_folded, b1_folded)
    return out[:B]


def reference_forward(sentiment_seq, price_seq, params):
    """Pure-JAX reference mirroring the PyTorch forward (eval mode)."""
    B, T = sentiment_seq.shape
    H = HIDDEN
    hp = lax.Precision.HIGHEST

    def rnn(x, w_ih, w_hh, b_ih, b_hh):   # x: (B, T, D)
        h = jnp.zeros((B, H), jnp.float32)
        for t in range(T):
            h = jnp.tanh(jnp.dot(x[:, t, :], w_ih.T, precision=hp) + b_ih +
                         jnp.dot(h, w_hh.T, precision=hp) + b_hh)
        return h

    s_last = rnn(sentiment_seq[..., None], params["w_ih_s"], params["w_hh_s"],
                 params["b_ih_s"], params["b_hh_s"])
    p_last = rnn(price_seq, params["w_ih_p"], params["w_hh_p"],
                 params["b_ih_p"], params["b_hh_p"])

    def bn(x, g, b, m, v):
        return (x - m) * lax.rsqrt(v + BN_EPS) * g + b

    s_bn = bn(s_last, params["bn_s_gamma"], params["bn_s_beta"],
              params["bn_s_mean"], params["bn_s_var"])
    p_bn = bn(p_last, params["bn_p_gamma"], params["bn_p_beta"],
              params["bn_p_mean"], params["bn_p_var"])
    feat = jnp.concatenate([s_bn, p_bn], axis=1)
    return jnp.dot(feat, params["fc1_w"].T, precision=hp) + params["fc1_b"]


if __name__ == "__main__":
    B, T = 2, 8
    input_size = (1, 4)   # (sentiment feature size == 1, price feature size)

    key = jax.random.PRNGKey(0)
    k_params, k_sent, k_price = jax.random.split(key, 3)

    params = init_params(k_params, input_size)
    sentiment_seq = jax.random.normal(k_sent, (B, T), jnp.float32)           # (B, T)
    price_seq = jax.random.normal(k_price, (B, T, input_size[1]), jnp.float32)

    out = rnn_1_fc_2_forward(sentiment_seq, price_seq, params)
    out = jax.block_until_ready(out)

    ref = reference_forward(sentiment_seq, price_seq, params)
    assert out.shape == (B, FC1_OUT), out.shape
    max_err = float(jnp.max(jnp.abs(out - ref)))
    assert max_err < 1e-2, f"max abs err {max_err}"

    # bn1 / fc2 of the PyTorch module are defined but never used in forward();
    # dropout is the identity in eval mode, so neither appears in the kernel.
    print("KERNEL_OK")
</pallas_src>

<mosaic_0001>
module attributes {stable_mosaic.version = 11 : i64} {
  func.func @rnn_fc_kernel(%arg0: memref<64x5xf32, #tpu.memory_space<vmem>>, %arg1: memref<5x128xf32, #tpu.memory_space<vmem>>, %arg2: memref<1x128xf32, #tpu.memory_space<vmem>>, %arg3: memref<128x128xf32, #tpu.memory_space<vmem>>, %arg4: memref<128x128xf32, #tpu.memory_space<vmem>>, %arg5: memref<1x128xf32, #tpu.memory_space<vmem>>, %arg6: memref<8x128xf32, #tpu.memory_space<vmem>>) attributes {dimension_semantics = [], scalar_prefetch = 0 : i64, scratch_operands = 0 : i64, tpu.core_type = #tpu.core_type<tc>} {
    %c0 = arith.constant 0 : index
    %c0_0 = arith.constant 0 : index
    %0 = vector.load %arg3[%c0, %c0_0] : memref<128x128xf32, #tpu.memory_space<vmem>>, vector<128x128xf32>
    %c0_1 = arith.constant 0 : index
    %c0_2 = arith.constant 0 : index
    %1 = vector.load %arg0[%c0_1, %c0_2] : memref<64x5xf32, #tpu.memory_space<vmem>>, vector<64x5xf32>
    %c0_3 = arith.constant 0 : index
    %c0_4 = arith.constant 0 : index
    %2 = vector.load %arg1[%c0_3, %c0_4] : memref<5x128xf32, #tpu.memory_space<vmem>>, vector<5x128xf32>
    %cst = arith.constant dense<0.000000e+00> : vector<64x128xf32>
    %3 = tpu.matmul %1, %2, %cst {dimension_numbers = #tpu.dot_dimension_numbers<[1], [0], [0], [1], [0, 0, 1, 1], [], []>} : vector<64x5xf32>, vector<5x128xf32>, vector<64x128xf32> -> vector<64x128xf32>
    %c0_5 = arith.constant 0 : index
    %c0_6 = arith.constant 0 : index
    %4 = vector.load %arg2[%c0_5, %c0_6] : memref<1x128xf32, #tpu.memory_space<vmem>>, vector<1x128xf32>
    %5 = vector.shape_cast %4 : vector<1x128xf32> to vector<1x128xf32>
    %6 = vector.broadcast %5 : vector<1x128xf32> to vector<64x128xf32>
    %7 = arith.addf %3, %6 : vector<64x128xf32>
    %cst_7 = arith.constant 0.000000e+00 : f32
    %8 = vector.broadcast %cst_7 : f32 to vector<8x128xf32>
    %9 = vector.extract_strided_slice %7 {offsets = [0, 0], sizes = [8, 128], strides = [1, 1]} : vector<64x128xf32> to vector<8x128xf32>
    %cst_8 = arith.constant dense<0.000000e+00> : vector<8x128xf32>
    %10 = tpu.matmul %8, %0, %cst_8 {dimension_numbers = #tpu.dot_dimension_numbers<[1], [0], [0], [1], [0, 0, 1, 1], [], []>} : vector<8x128xf32>, vector<128x128xf32>, vector<8x128xf32> -> vector<8x128xf32>
    %11 = arith.addf %9, %10 : vector<8x128xf32>
    %12 = math.tanh %11 : vector<8x128xf32>
    %13 = vector.extract_strided_slice %7 {offsets = [8, 0], sizes = [8, 128], strides = [1, 1]} : vector<64x128xf32> to vector<8x128xf32>
    %cst_9 = arith.constant dense<0.000000e+00> : vector<8x128xf32>
    %14 = tpu.matmul %12, %0, %cst_9 {dimension_numbers = #tpu.dot_dimension_numbers<[1], [0], [0], [1], [0, 0, 1, 1], [], []>} : vector<8x128xf32>, vector<128x128xf32>, vector<8x128xf32> -> vector<8x128xf32>
    %15 = arith.addf %13, %14 : vector<8x128xf32>
    %16 = math.tanh %15 : vector<8x128xf32>
    %17 = vector.extract_strided_slice %7 {offsets = [16, 0], sizes = [8, 128], strides = [1, 1]} : vector<64x128xf32> to vector<8x128xf32>
    %cst_10 = arith.constant dense<0.000000e+00> : vector<8x128xf32>
    %18 = tpu.matmul %16, %0, %cst_10 {dimension_numbers = #tpu.dot_dimension_numbers<[1], [0], [0], [1], [0, 0, 1, 1], [], []>} : vector<8x128xf32>, vector<128x128xf32>, vector<8x128xf32> -> vector<8x128xf32>
    %19 = arith.addf %17, %18 : vector<8x128xf32>
    %20 = math.tanh %19 : vector<8x128xf32>
    %21 = vector.extract_strided_slice %7 {offsets = [24, 0], sizes = [8, 128], strides = [1, 1]} : vector<64x128xf32> to vector<8x128xf32>
    %cst_11 = arith.constant dense<0.000000e+00> : vector<8x128xf32>
    %22 = tpu.matmul %20, %0, %cst_11 {dimension_numbers = #tpu.dot_dimension_numbers<[1], [0], [0], [1], [0, 0, 1, 1], [], []>} : vector<8x128xf32>, vector<128x128xf32>, vector<8x128xf32> -> vector<8x128xf32>
    %23 = arith.addf %21, %22 : vector<8x128xf32>
    %24 = math.tanh %23 : vector<8x128xf32>
    %25 = vector.extract_strided_slice %7 {offsets = [32, 0], sizes = [8, 128], strides = [1, 1]} : vector<64x128xf32> to vector<8x128xf32>
    %cst_12 = arith.constant dense<0.000000e+00> : vector<8x128xf32>
    %26 = tpu.matmul %24, %0, %cst_12 {dimension_numbers = #tpu.dot_dimension_numbers<[1], [0], [0], [1], [0, 0, 1, 1], [], []>} : vector<8x128xf32>, vector<128x128xf32>, vector<8x128xf32> -> vector<8x128xf32>
    %27 = arith.addf %25, %26 : vector<8x128xf32>
    %28 = math.tanh %27 : vector<8x128xf32>
    %29 = vector.extract_strided_slice %7 {offsets = [40, 0], sizes = [8, 128], strides = [1, 1]} : vector<64x128xf32> to vector<8x128xf32>
    %cst_13 = arith.constant dense<0.000000e+00> : vector<8x128xf32>
    %30 = tpu.matmul %28, %0, %cst_13 {dimension_numbers = #tpu.dot_dimension_numbers<[1], [0], [0], [1], [0, 0, 1, 1], [], []>} : vector<8x128xf32>, vector<128x128xf32>, vector<8x128xf32> -> vector<8x128xf32>
    %31 = arith.addf %29, %30 : vector<8x128xf32>
    %32 = math.tanh %31 : vector<8x128xf32>
    %33 = vector.extract_strided_slice %7 {offsets = [48, 0], sizes = [8, 128], strides = [1, 1]} : vector<64x128xf32> to vector<8x128xf32>
    %cst_14 = arith.constant dense<0.000000e+00> : vector<8x128xf32>
    %34 = tpu.matmul %32, %0, %cst_14 {dimension_numbers = #tpu.dot_dimension_numbers<[1], [0], [0], [1], [0, 0, 1, 1], [], []>} : vector<8x128xf32>, vector<128x128xf32>, vector<8x128xf32> -> vector<8x128xf32>
    %35 = arith.addf %33, %34 : vector<8x128xf32>
    %36 = math.tanh %35 : vector<8x128xf32>
    %37 = vector.extract_strided_slice %7 {offsets = [56, 0], sizes = [8, 128], strides = [1, 1]} : vector<64x128xf32> to vector<8x128xf32>
    %cst_15 = arith.constant dense<0.000000e+00> : vector<8x128xf32>
    %38 = tpu.matmul %36, %0, %cst_15 {dimension_numbers = #tpu.dot_dimension_numbers<[1], [0], [0], [1], [0, 0, 1, 1], [], []>} : vector<8x128xf32>, vector<128x128xf32>, vector<8x128xf32> -> vector<8x128xf32>
    %39 = arith.addf %37, %38 : vector<8x128xf32>
    %40 = math.tanh %39 : vector<8x128xf32>
    %c0_16 = arith.constant 0 : index
    %c0_17 = arith.constant 0 : index
    %41 = vector.load %arg4[%c0_16, %c0_17] : memref<128x128xf32, #tpu.memory_space<vmem>>, vector<128x128xf32>
    %cst_18 = arith.constant dense<0.000000e+00> : vector<8x128xf32>
    %42 = tpu.matmul %40, %41, %cst_18 {dimension_numbers = #tpu.dot_dimension_numbers<[1], [0], [0], [1], [0, 0, 1, 1], [], []>} : vector<8x128xf32>, vector<128x128xf32>, vector<8x128xf32> -> vector<8x128xf32>
    %c0_19 = arith.constant 0 : index
    %c0_20 = arith.constant 0 : index
    %43 = vector.load %arg5[%c0_19, %c0_20] : memref<1x128xf32, #tpu.memory_space<vmem>>, vector<1x128xf32>
    %44 = vector.broadcast %43 : vector<1x128xf32> to vector<8x128xf32>
    %45 = arith.addf %42, %44 : vector<8x128xf32>
    %c0_21 = arith.constant 0 : index
    %c0_22 = arith.constant 0 : index
    %46 = vector.load %arg6[%c0_21, %c0_22] : memref<8x128xf32, #tpu.memory_space<vmem>>, vector<8x128xf32>
    tpu.vector_store %arg6[%c0_21, %c0_22], %45 {strides = array<i32>} : memref<8x128xf32, #tpu.memory_space<vmem>>, vector<8x128xf32>,
    return
  }
}

</mosaic_0001>

<bundles_post_ra>
// kernel: tpu_custom_call.1
= control target key start
LH: loop header
LB: loop body
LE: loop exit
PB: predicated region body
PF: predicated region fallthrough
CT: control target
= control target key end

     0   :  { %11 = vsyncpa [#allocation3], 0  ;;  %s2031_s0 = inlined_call_operand.vmem [shape: f32[64,5], index: 0, kind: input, shape index: {}]   ;;  %s2032_s1 = inlined_call_operand.vmem [shape: f32[5,128], index: 1, kind: input, shape index: {}]   ;;  %s2033_s2 = inlined_call_operand.vmem [shape: f32[1,128], index: 2, kind: input, shape index: {}]   ;;  %s2034_s3 = inlined_call_operand.hbm [shape: f32[128,128], index: 3, kind: input, shape index: {}]   ;;  %s2035_s4 = inlined_call_operand.hbm [shape: f32[128,128], index: 4, kind: input, shape index: {}]   ;;  %s2036_s5 = inlined_call_operand.vmem [shape: f32[1,128], index: 5, kind: input, shape index: {}]   ;;  %s2037_s6 = inlined_call_operand.hbm [shape: f32[8,128], index: 6, kind: output, shape index: {}]  }
   0x1   :  { %12 = vsyncpa [#allocation6], 0 }
   0x2   :  { %13 = vsyncpa [#allocation4], 0  ;;  %s1718_s21 = smov [#allocation2]   ;;  %s1646_s25 = scalar_lea.hbm %s2034_s3, 2048 }
   0x3   :  { %s25_s22 = sshll.u32 %s1718_s21, 4  ;;  %p1647_p0 = scmp.ne.s32.totalorder %s2034_s3, %s1646_s25  ;;  %s26_s22 = int_to_ptr.vmem [resolvable:$true] %s25_s22 }
   0x4   :  { %p1650_p1 = scmp.lt.u32.totalorder %s1646_s25, %s2034_s3 }
   0x6   :  { %p1652_p2 = pnand %p1650_p1, %p1647_p0 }
   0x8   :  { %1655 = shalt.err (!%p1652_p2)
}
   0x9   :  { %s1656_s30 = scalar_lea.vmem %s26_s22, 2048  ;;  %p1661_p4 = scmp.lt.s32.totalorder %s26_s22, %s26_s22 }
   0xa   :  { %p1657_p3 = scmp.ne.s32.totalorder %s26_s22, %s1656_s30  ;;  %p1662_p5 = scmp.lt.s32.totalorder %s1656_s30, %s1656_s30 }
   0xc   :  { %p1663_p6 = por %p1662_p5, %p1661_p4 }
   0xe   :  { %p1664_p7 = pnand %p1663_p6, %p1657_p3 }
  0x10   :  { %1667 = shalt.err (!%p1664_p7)
}
  0x11   :  { %s1719_s7 = smov 128   ;;  %s1720_s8 = smov 8  }
  0x12   :  { %31 = dma.hbm_to_vmem [thread:$0]  %s2034_s3, 2048, %s26_s22, [#allocation3], %s1719_s7, %s1719_s7, %s1720_s8  }
  0x13   :  { %s1721_s11 = smov [#allocation5]   ;;  %s1668_s15 = scalar_lea.hbm %s2035_s4, 2048 }
  0x14   :  { %s37_s12 = sshll.u32 %s1721_s11, 4  ;;  %p1669_p8 = scmp.ne.s32.totalorder %s2035_s4, %s1668_s15  ;;  %s38_s12 = int_to_ptr.vmem [resolvable:$true] %s37_s12 }
  0x15   :  { %p1672_p9 = scmp.lt.u32.totalorder %s1668_s15, %s2035_s4 }
  0x17   :  { %p1674_p10 = pnand %p1672_p9, %p1669_p8 }
  0x19   :  { %1677 = shalt.err (!%p1674_p10)
}
  0x1a   :  { %s1678_s20 = scalar_lea.vmem %s38_s12, 2048  ;;  %p1683_p12 = scmp.lt.s32.totalorder %s38_s12, %s38_s12 }
  0x1b   :  { %p1679_p11 = scmp.ne.s32.totalorder %s38_s12, %s1678_s20  ;;  %p1684_p13 = scmp.lt.s32.totalorder %s1678_s20, %s1678_s20 }
  0x1d   :  { %p1685_p0 = por %p1684_p13, %p1683_p12 }
  0x1f   :  { %p1686_p1 = pnand %p1685_p0, %p1679_p11 }
  0x21   :  { %1689 = shalt.err (!%p1686_p1)
}
  0x22   :  { %43 = dma.hbm_to_vmem [thread:$0]  %s2035_s4, 2048, %s38_s12, [#allocation6], %s1719_s7, %s1719_s7, %s1720_s8  }
  0x23   :  { %1712 = dma.done.wait [#allocation3], 2048  }
  0x24   :  { %1713 = vsyncadd [#allocation3], 4294965248 }
  0x25   :  { %1714 = dma.done.wait [#allocation6], 2048  }
  0x26   :  { %1715 = vsyncadd [#allocation6], 4294965248  ;;  %v1722_v0 = vmov 0.0|0.0   ;;  %vm1723_vm0 = vmmov 0   ;;  %v1724_v1 = vmov 0.0   ;;  %v52_v2 = vld [vmem:[#allocation2] sm:$0xff] }
  0x27   :  { %1406 = vmatprep.subr.bf16.mxu1 %v1722_v0  ;;  %1123 = vmatprep.mubr.msk.f32.mxu1 %vm1723_vm0, %v1724_v1  ;;  %v53_v3 = vld [vmem:[#allocation2 + $0x8] sm:$0xff]  ;;  %v54_v4 = vld [vmem:[#allocation2 + $0x10] sm:$0xff]  ;;  %v55_v6 = vld [vmem:[#allocation2 + $0x18] sm:$0xff]  ;;  %vm109_vm1 = vcmask 1044480   ;;  %vm84_vm2 = vcmask 39936   ;;  %s1725_s16 = smov [#allocation7]  }
  0x28   :  { %v1788_v5 = vpack.c.bf16 %v53_v3, %v52_v2  ;;  %v1791_v7 = vpack.c.bf16 %v55_v6, %v54_v4  ;;  %v56_v8 = vld [vmem:[#allocation2 + $0x20] sm:$0xff]  ;;  %v57_v9 = vld [vmem:[#allocation2 + $0x28] sm:$0xff]  ;;  %v58_v14 = vld [vmem:[#allocation2 + $0x30] sm:$0xff]  ;;  %s894_s17 = sshll.u32 %s1725_s16, 4  ;;  %s895_s17 = int_to_ptr.vmem [resolvable:$true] %s894_s17 }
  0x29   :  { %v76_v10 = vld [vmem:[%s2032_s1] sm:$0x1f]  ;;  %v69_v12 = vld [vmem:[%s2031_s0 + $0x8] sm:$0xff]  ;;  %v1805_v13 = vpack.c.bf16 %v57_v9, %v56_v8  ;;  %v59_v15 = vld [vmem:[#allocation2 + $0x38] sm:$0xff]  ;;  %s1690_s18 = scalar_lea.vmem %s895_s17, 128  ;;  %p1695_p3 = scmp.lt.s32.totalorder %s895_s17, %s895_s17 }
  0x2a   :  { %1408 = vmatpush3.bf16.msra.mxu1 %v1788_v5  ;;  %1077 = vmatprep.subr.msk.mxu0 %vm109_vm1, %v76_v10  ;;  %v68_v11 = vld [vmem:[%s2031_s0] sm:$0xff]  ;;  %v1813_v16 = vpack.c.bf16 %v59_v15, %v58_v14  ;;  %v61_v18 = vld [vmem:[#allocation2 + $0x48] sm:$0xff]  ;;  %v62_v20 = vld [vmem:[#allocation2 + $0x50] sm:$0xff]  ;;  %p1691_p2 = scmp.ne.s32.totalorder %s895_s17, %s1690_s18  ;;  %p1696_p4 = scmp.lt.s32.totalorder %s1690_s18, %s1690_s18 }
  0x2b   :  { %1409 = vmatprep.subr.bf16.mxu1 %v1722_v0  ;;  %1078 = vmatpush3.msk.msra.mxu0 %vm109_vm1, %v76_v10  ;;  %v60_v17 = vld [vmem:[#allocation2 + $0x40] sm:$0xff]  ;;  %v63_v21 = vld [vmem:[#allocation2 + $0x58] sm:$0xff]  ;;  %v65_v24 = vld [vmem:[#allocation2 + $0x68] sm:$0xff] }
  0x2c   :  { %1079 = vmatprep.mubr.msk.f32.mxu0 %vm84_vm2, %v68_v11  ;;  %1430 = vmatprep.subr.bf16.mxu0 %v1722_v0  ;;  %v1819_v19 = vpack.c.bf16 %v61_v18, %v60_v17  ;;  %v1825_v22 = vpack.c.bf16 %v63_v21, %v62_v20  ;;  %v64_v23 = vld [vmem:[#allocation2 + $0x60] sm:$0xff]  ;;  %v66_v26 = vld [vmem:[#allocation2 + $0x70] sm:$0xff]  ;;  %v67_v27 = vld [vmem:[#allocation2 + $0x78] sm:$0xff]  ;;  %p1697_p5 = por %p1696_p4, %p1695_p3 }
  0x2d   :  { %1080 = vmatmul.mubr.msk.f32.vlgmr.msra.gmra.mrb[0].mxu0 %vm84_vm2, %v69_v12  ;;  %v1831_v25 = vpack.c.bf16 %v65_v24, %v64_v23  ;;  %v1837_v28 = vpack.c.bf16 %v67_v27, %v66_v26  ;;  %v70_v29 = vld [vmem:[%s2031_s0 + $0x10] sm:$0xff]  ;;  %v71_v30 = vld [vmem:[%s2031_s0 + $0x18] sm:$0xff]  ;;  %v72_v31 = vld [vmem:[%s2031_s0 + $0x20] sm:$0xff] }
  0x2e   :  { %1411 = vmatpush3.bf16.msra.mxu1 %v1791_v7  ;;  %1432 = vmatpush3.bf16.msra.mxu0 %v1788_v5  ;;  %v73_v32 = vld [vmem:[%s2031_s0 + $0x28] sm:$0xff]  ;;  %v74_v33 = vld [vmem:[%s2031_s0 + $0x30] sm:$0xff]  ;;  %v75_v34 = vld [vmem:[%s2031_s0 + $0x38] sm:$0xff]  ;;  %p1698_p6 = pnand %p1697_p5, %p1691_p2 }
  0x2f   :  { %1412 = vmatprep.subr.bf16.mxu1 %v1722_v0  ;;  %1433 = vmatprep.subr.bf16.mxu0 %v1722_v0  ;;  %v1896_v37 = vld [vmem:[%s2033_s2] ss:$0 sm:$0xff]  ;;  %v796_v14 = vld [vmem:[#allocation5 + $0x10] sm:$0xff]  ;;  %v803_v24 = vld [vmem:[#allocation5 + $0x48] sm:$0xff] }
  0x30   :  { %1082 = vmatprep.mubr.msk.f32.mxu0 %vm84_vm2, %v70_v29  ;;  %v794_v12 = vld [vmem:[#allocation5] sm:$0xff]  ;;  %v800_v21 = vld [vmem:[#allocation5 + $0x30] sm:$0xff] }
  0x31   :  { %1083 = vmatmul.mubr.msk.f32.gmra.mrb[2].mxu0 %vm84_vm2, %v71_v30  ;;  %v798_v18 = vld [vmem:[#allocation5 + $0x20] sm:$0xff] }
  0x32   :  { %1414 = vmatpush3.bf16.msra.mxu1 %v1805_v13  ;;  %1435 = vmatpush3.bf16.msra.mxu0 %v1791_v7 }
  0x33   :  { %1415 = vmatprep.subr.bf16.mxu1 %v1722_v0  ;;  %1436 = vmatprep.subr.bf16.mxu0 %v1722_v0 }
  0x34   :  { %1085 = vmatprep.mubr.msk.f32.mxu0 %vm84_vm2, %v72_v31  ;;  %v804_v31 = vld [vmem:[#allocation5 + $0x50] sm:$0xff] }
  0x35   :  { %1086 = vmatmul.mubr.msk.f32.gmra.mrb[4].mxu0 %vm84_vm2, %v73_v32  ;;  %v805_v32 = vld [vmem:[#allocation5 + $0x58] sm:$0xff] }
  0x36   :  { %1417 = vmatpush3.bf16.msra.mxu1 %v1813_v16  ;;  %1438 = vmatpush3.bf16.msra.mxu0 %v1805_v13 }
  0x37   :  { %1418 = vmatprep.subr.bf16.mxu1 %v1722_v0  ;;  %1439 = vmatprep.subr.bf16.mxu0 %v1722_v0 }
  0x38   :  { %1088 = vmatprep.mubr.msk.f32.mxu0 %vm84_vm2, %v74_v33  ;;  %v1614_v33 = vpack.c.bf16 %v805_v32, %v804_v31 }
  0x39   :  { %1089 = vmatmul.mubr.msk.f32.gmra.mrb[6].mxu0 %vm84_vm2, %v75_v34  ;;  %v806_v34 = vld [vmem:[#allocation5 + $0x60] sm:$0xff] }
  0x3a   :  { %1420 = vmatpush3.bf16.msra.mxu1 %v1819_v19  ;;  %1441 = vmatpush3.bf16.msra.mxu0 %v1813_v16 }
  0x3b   :  { %1421 = vmatprep.subr.bf16.mxu1 %v1722_v0  ;;  %1442 = vmatprep.subr.bf16.mxu0 %v1722_v0 }
  0x3c   :  { %1158 = vmatprep.mubr.msk.f32.mxu0 %vm1723_vm0, %v1724_v1 }
  0x3e   :  { %1423 = vmatpush3.bf16.msra.mxu1 %v1825_v22  ;;  %1444 = vmatpush3.bf16.msra.mxu0 %v1819_v19 }
  0x3f   :  { %1424 = vmatprep.subr.bf16.mxu1 %v1722_v0  ;;  %1445 = vmatprep.subr.bf16.mxu0 %v1722_v0 }
  0x42   :  { %1426 = vmatpush3.bf16.msra.mxu1 %v1831_v25  ;;  %1447 = vmatpush3.bf16.msra.mxu0 %v1825_v22 }
  0x43   :  { %1427 = vmatprep.subr.bf16.mxu1 %v1722_v0  ;;  %1448 = vmatprep.subr.bf16.mxu0 %v1722_v0 }
  0x46   :  { %1429 = vmatpush3.bf16.msra.mxu1 %v1837_v28  ;;  %1450 = vmatpush3.bf16.msra.mxu0 %v1831_v25 }
  0x47   :  { %1454 = vmatprep.subr.bf16.mxu1 %v1722_v0  ;;  %1451 = vmatprep.subr.bf16.mxu0 %v1722_v0 }
  0x49   :  { %1124 = vmatmul.mubr.f32.vlgmr.msra.gmra.mrb[0].mxu1 %v1724_v1 }
  0x4a   :  { %1456 = vmatpush3.bf16.msra.mxu1 %v1788_v5  ;;  %1193 = vmatprep.mubr.msk.f32.mxu1 %vm1723_vm0, %v1724_v1 }
  0x4b   :  { %1457 = vmatprep.subr.bf16.mxu1 %v1722_v0  ;;  %1453 = vmatpush3.bf16.msra.mxu0 %v1837_v28 }
  0x4c   :  { %1478 = vmatprep.subr.bf16.mxu0 %v1722_v0 }
  0x4e   :  { %1459 = vmatpush3.bf16.msra.mxu1 %v1791_v7 }
  0x4f   :  { %1460 = vmatprep.subr.bf16.mxu1 %v1722_v0 }
  0x52   :  { %1462 = vmatpush3.bf16.msra.mxu1 %v1805_v13 }
  0x53   :  { %1463 = vmatprep.subr.bf16.mxu1 %v1722_v0 }
  0x56   :  { %1465 = vmatpush3.bf16.msra.mxu1 %v1813_v16 }
  0x57   :  { %1466 = vmatprep.subr.bf16.mxu1 %v1722_v0 }
  0x5a   :  { %1468 = vmatpush3.bf16.msra.mxu1 %v1819_v19 }
  0x5b   :  { %1469 = vmatprep.subr.bf16.mxu1 %v1722_v0 }
  0x5e   :  { %1471 = vmatpush3.bf16.msra.mxu1 %v1825_v22 }
  0x5f   :  { %1472 = vmatprep.subr.bf16.mxu1 %v1722_v0 }
  0x62   :  { %1474 = vmatpush3.bf16.msra.mxu1 %v1831_v25 }
  0x63   :  { %1475 = vmatprep.subr.bf16.mxu1 %v1722_v0 }
  0x66   :  { %1477 = vmatpush3.bf16.msra.mxu1 %v1837_v28 }
  0x67   :  { %1502 = vmatprep.subr.bf16.mxu1 %v1722_v0 }
 0x100   :  { %v1081_v35 = vpop.f32.mrb[0].mxu0 }
 0x101   :  { %v179_v36 = vpop.f32.mrb[1].mxu0  ;;  %v185_v49 = vadd.f32 %v1081_v35, %v1896_v37  ;;  %v807_v35 = vld [vmem:[#allocation5 + $0x68] sm:$0xff] }
 0x102   :  { %v180_v38 = vadd.f32 %v1896_v37, %v179_v36  ;;  %v1617_v36 = vpack.c.bf16 %v807_v35, %v806_v34 }
 0x104   :  { %v1084_v43 = vpop.f32.mrb[2].mxu0 }
 0x105   :  { %v189_v44 = vpop.f32.mrb[3].mxu0  ;;  %v195_v59 = vadd.f32 %v1084_v43, %v1896_v37 }
 0x106   :  { %v190_v54 = vadd.f32 %v1896_v37, %v189_v44 }
 0x108   :  { %v1917_v45 = vpop.f32.mrb[4].mxu0 }
 0x109   :  { %v1919_v46 = vpop.f32.mrb[5].mxu0 }
 0x10a   :  { %v200_v2 = vadd.f32 %v1896_v37, %v1919_v46  ;;  %v914_v46 = vld [vmem:[%s2036_s5] ss:$0 sm:$0xff] }
 0x10c   :  { %v1921_v47 = vpop.f32.mrb[6].mxu0 }
 0x10d   :  { %v1923_v48 = vpop.f32.mrb[7].mxu0 }
 0x10e   :  { %v210_v26 = vadd.f32 %v1896_v37, %v1923_v48 }
 0x11c   :  { %v284_v39 = vpop.f32.mrb[0].mxu1 }
 0x11d   :  { %v288_v40 = vadd.f32 %v284_v39, %v180_v38  ;;  %v1125_v41 = vpop.f32.mrb[1].mxu1  ;;  %v808_v38 = vld [vmem:[#allocation5 + $0x70] sm:$0xff]  ;;  %v809_v39 = vld [vmem:[#allocation5 + $0x78] sm:$0xff] }
 0x11e   :  { %v215_v41 = vadd.f32 %v1921_v47, %v1896_v37 }
 0x11f   :  { %1630 = vtanh.f32 %v288_v40  ;;  %v1620_v40 = vpack.c.bf16 %v809_v39, %v808_v38 }
 0x129   :  { %v1631_v42 = vpop.eup %1630 }
 0x12a   :  { %1159 = vmatmul.mubr.f32.vlgmr.msra.gmra.mrb[8].mxu0 %v1631_v42 }
 0x12b   :  { %1480 = vmatpush3.bf16.msra.mxu0 %v1788_v5  ;;  %1228 = vmatprep.mubr.msk.f32.mxu0 %vm1723_vm0, %v1724_v1 }
 0x12c   :  { %1481 = vmatprep.subr.bf16.mxu0 %v1722_v0 }
 0x12f   :  { %1483 = vmatpush3.bf16.msra.mxu0 %v1791_v7 }
 0x130   :  { %1484 = vmatprep.subr.bf16.mxu0 %v1722_v0 }
 0x133   :  { %1486 = vmatpush3.bf16.msra.mxu0 %v1805_v13 }
 0x134   :  { %1487 = vmatprep.subr.bf16.mxu0 %v1722_v0 }
 0x137   :  { %1489 = vmatpush3.bf16.msra.mxu0 %v1813_v16 }
 0x138   :  { %1490 = vmatprep.subr.bf16.mxu0 %v1722_v0 }
 0x13b   :  { %1492 = vmatpush3.bf16.msra.mxu0 %v1819_v19 }
 0x13c   :  { %1493 = vmatprep.subr.bf16.mxu0 %v1722_v0 }
 0x13f   :  { %1495 = vmatpush3.bf16.msra.mxu0 %v1825_v22 }
 0x140   :  { %1496 = vmatprep.subr.bf16.mxu0 %v1722_v0 }
 0x143   :  { %1498 = vmatpush3.bf16.msra.mxu0 %v1831_v25 }
 0x144   :  { %1499 = vmatprep.subr.bf16.mxu0 %v1722_v0 }
 0x147   :  { %1501 = vmatpush3.bf16.msra.mxu0 %v1837_v28 }
 0x148   :  { %1526 = vmatprep.subr.bf16.mxu0 %v1722_v0 }
 0x1fd   :  { %v356_v50 = vpop.f32.mrb[8].mxu0 }
 0x1fe   :  { %v360_v51 = vadd.f32 %v356_v50, %v185_v49  ;;  %v1160_v52 = vpop.f32.mrb[9].mxu0 }
 0x200   :  { %1632 = vtanh.f32 %v360_v51 }
 0x20a   :  { %v1633_v53 = vpop.eup %1632 }
 0x20b   :  { %1194 = vmatmul.mubr.f32.vlgmr.msra.gmra.mrb[2].mxu1 %v1633_v53 }
 0x20c   :  { %1504 = vmatpush3.bf16.msra.mxu1 %v1788_v5  ;;  %1263 = vmatprep.mubr.msk.f32.mxu1 %vm1723_vm0, %v1724_v1 }
 0x20d   :  { %1505 = vmatprep.subr.bf16.mxu1 %v1722_v0 }
 0x210   :  { %1507 = vmatpush3.bf16.msra.mxu1 %v1791_v7 }
 0x211   :  { %1508 = vmatprep.subr.bf16.mxu1 %v1722_v0 }
 0x214   :  { %1510 = vmatpush3.bf16.msra.mxu1 %v1805_v13 }
 0x215   :  { %1511 = vmatprep.subr.bf16.mxu1 %v1722_v0 }
 0x218   :  { %1513 = vmatpush3.bf16.msra.mxu1 %v1813_v16 }
 0x219   :  { %1514 = vmatprep.subr.bf16.mxu1 %v1722_v0 }
 0x21c   :  { %1516 = vmatpush3.bf16.msra.mxu1 %v1819_v19 }
 0x21d   :  { %1517 = vmatprep.subr.bf16.mxu1 %v1722_v0 }
 0x220   :  { %1519 = vmatpush3.bf16.msra.mxu1 %v1825_v22 }
 0x221   :  { %1520 = vmatprep.subr.bf16.mxu1 %v1722_v0 }
 0x224   :  { %1522 = vmatpush3.bf16.msra.mxu1 %v1831_v25 }
 0x225   :  { %1523 = vmatprep.subr.bf16.mxu1 %v1722_v0 }
 0x228   :  { %1525 = vmatpush3.bf16.msra.mxu1 %v1837_v28 }
 0x229   :  { %1550 = vmatprep.subr.bf16.mxu1 %v1722_v0 }
 0x2de   :  { %v428_v55 = vpop.f32.mrb[2].mxu1 }
 0x2df   :  { %v432_v56 = vadd.f32 %v428_v55, %v190_v54  ;;  %v1195_v57 = vpop.f32.mrb[3].mxu1 }
 0x2e1   :  { %1634 = vtanh.f32 %v432_v56 }
 0x2eb   :  { %v1635_v58 = vpop.eup %1634 }
 0x2ec   :  { %1229 = vmatmul.mubr.f32.vlgmr.msra.gmra.mrb[10].mxu0 %v1635_v58 }
 0x2ed   :  { %1528 = vmatpush3.bf16.msra.mxu0 %v1788_v5  ;;  %1298 = vmatprep.mubr.msk.f32.mxu0 %vm1723_vm0, %v1724_v1 }
 0x2ee   :  { %1529 = vmatprep.subr.bf16.mxu0 %v1722_v0 }
 0x2f1   :  { %1531 = vmatpush3.bf16.msra.mxu0 %v1791_v7 }
 0x2f2   :  { %1532 = vmatprep.subr.bf16.mxu0 %v1722_v0 }
 0x2f5   :  { %1534 = vmatpush3.bf16.msra.mxu0 %v1805_v13 }
 0x2f6   :  { %1535 = vmatprep.subr.bf16.mxu0 %v1722_v0 }
 0x2f9   :  { %1537 = vmatpush3.bf16.msra.mxu0 %v1813_v16 }
 0x2fa   :  { %1538 = vmatprep.subr.bf16.mxu0 %v1722_v0 }
 0x2fd   :  { %1540 = vmatpush3.bf16.msra.mxu0 %v1819_v19 }
 0x2fe   :  { %1541 = vmatprep.subr.bf16.mxu0 %v1722_v0 }
 0x301   :  { %1543 = vmatpush3.bf16.msra.mxu0 %v1825_v22 }
 0x302   :  { %1544 = vmatprep.subr.bf16.mxu0 %v1722_v0 }
 0x305   :  { %1546 = vmatpush3.bf16.msra.mxu0 %v1831_v25 }
 0x306   :  { %1547 = vmatprep.subr.bf16.mxu0 %v1722_v0 }
 0x309   :  { %1549 = vmatpush3.bf16.msra.mxu0 %v1837_v28 }
 0x30a   :  { %1574 = vmatprep.subr.bf16.mxu0 %v1722_v0 }
 0x3bf   :  { %v500_v60 = vpop.f32.mrb[10].mxu0 }
 0x3c0   :  { %v504_v61 = vadd.f32 %v500_v60, %v195_v59  ;;  %v1230_v62 = vpop.f32.mrb[11].mxu0 }
 0x3c2   :  { %1636 = vtanh.f32 %v504_v61 }
 0x3cc   :  { %v1637_v63 = vpop.eup %1636 }
 0x3cd   :  { %1264 = vmatmul.mubr.f32.vlgmr.msra.gmra.mrb[4].mxu1 %v1637_v63 }
 0x3ce   :  { %1552 = vmatpush3.bf16.msra.mxu1 %v1788_v5  ;;  %1333 = vmatprep.mubr.msk.f32.mxu1 %vm1723_vm0, %v1724_v1 }
 0x3cf   :  { %1553 = vmatprep.subr.bf16.mxu1 %v1722_v0 }
 0x3d2   :  { %1555 = vmatpush3.bf16.msra.mxu1 %v1791_v7 }
 0x3d3   :  { %1556 = vmatprep.subr.bf16.mxu1 %v1722_v0 }
 0x3d6   :  { %1558 = vmatpush3.bf16.msra.mxu1 %v1805_v13 }
 0x3d7   :  { %1559 = vmatprep.subr.bf16.mxu1 %v1722_v0 }
 0x3da   :  { %1561 = vmatpush3.bf16.msra.mxu1 %v1813_v16 }
 0x3db   :  { %1562 = vmatprep.subr.bf16.mxu1 %v1722_v0 }
 0x3de   :  { %1564 = vmatpush3.bf16.msra.mxu1 %v1819_v19 }
 0x3df   :  { %1565 = vmatprep.subr.bf16.mxu1 %v1722_v0 }
 0x3e2   :  { %1567 = vmatpush3.bf16.msra.mxu1 %v1825_v22 }
 0x3e3   :  { %1568 = vmatprep.subr.bf16.mxu1 %v1722_v0 }
 0x3e6   :  { %1570 = vmatpush3.bf16.msra.mxu1 %v1831_v25 }
 0x3e7   :  { %1571 = vmatprep.subr.bf16.mxu1 %v1722_v0 }
 0x3ea   :  { %1573 = vmatpush3.bf16.msra.mxu1 %v1837_v28 }
 0x3eb   :  { %1598 = vmatprep.subr.bf16.mxu1 %v1722_v0 }
 0x4a0   :  { %v572_v3 = vpop.f32.mrb[4].mxu1 }
 0x4a1   :  { %v576_v4 = vadd.f32 %v572_v3, %v200_v2  ;;  %v1265_v6 = vpop.f32.mrb[5].mxu1 }
 0x4a3   :  { %1638 = vtanh.f32 %v576_v4 }
 0x4ad   :  { %v1639_v8 = vpop.eup %1638 }
 0x4ae   :  { %1299 = vmatmul.mubr.f32.vlgmr.msra.gmra.mrb[12].mxu0 %v1639_v8 }
 0x4af   :  { %1576 = vmatpush3.bf16.msra.mxu0 %v1788_v5  ;;  %1368 = vmatprep.mubr.msk.f32.mxu0 %vm1723_vm0, %v1724_v1  ;;  %v205_v5 = vadd.f32 %v1917_v45, %v1896_v37 }
 0x4b0   :  { %1577 = vmatprep.subr.bf16.mxu0 %v1722_v0 }
 0x4b3   :  { %1579 = vmatpush3.bf16.msra.mxu0 %v1791_v7 }
 0x4b4   :  { %1580 = vmatprep.subr.bf16.mxu0 %v1722_v0 }
 0x4b7   :  { %1582 = vmatpush3.bf16.msra.mxu0 %v1805_v13  ;;  %v795_v13 = vld [vmem:[#allocation5 + $0x8] sm:$0xff] }
 0x4b8   :  { %1583 = vmatprep.subr.bf16.mxu0 %v1722_v0  ;;  %v1599_v15 = vpack.c.bf16 %v795_v13, %v794_v12 }
 0x4bb   :  { %1585 = vmatpush3.bf16.msra.mxu0 %v1813_v16  ;;  %v797_v16 = vld [vmem:[#allocation5 + $0x18] sm:$0xff] }
 0x4bc   :  { %1586 = vmatprep.subr.bf16.mxu0 %v1722_v0  ;;  %v1602_v17 = vpack.c.bf16 %v797_v16, %v796_v14 }
 0x4bf   :  { %1588 = vmatpush3.bf16.msra.mxu0 %v1819_v19  ;;  %v799_v19 = vld [vmem:[#allocation5 + $0x28] sm:$0xff] }
 0x4c0   :  { %1589 = vmatprep.subr.bf16.mxu0 %v1722_v0  ;;  %v1605_v20 = vpack.c.bf16 %v799_v19, %v798_v18 }
 0x4c3   :  { %1591 = vmatpush3.bf16.msra.mxu0 %v1825_v22  ;;  %v801_v22 = vld [vmem:[#allocation5 + $0x38] sm:$0xff] }
 0x4c4   :  { %1592 = vmatprep.subr.bf16.mxu0 %v1722_v0  ;;  %v1608_v23 = vpack.c.bf16 %v801_v22, %v800_v21 }
 0x4c7   :  { %1594 = vmatpush3.bf16.msra.mxu0 %v1831_v25 }
 0x4c8   :  { %1595 = vmatprep.subr.bf16.mxu0 %v1722_v0 }
 0x4cb   :  { %1597 = vmatpush3.bf16.msra.mxu0 %v1837_v28 }
 0x581   :  { %v644_v7 = vpop.f32.mrb[12].mxu0 }
 0x582   :  { %v648_v9 = vadd.f32 %v644_v7, %v205_v5  ;;  %v1300_v10 = vpop.f32.mrb[13].mxu0 }
 0x584   :  { %1640 = vtanh.f32 %v648_v9 }
 0x58e   :  { %v1641_v11 = vpop.eup %1640 }
 0x58f   :  { %1334 = vmatmul.mubr.f32.vlgmr.msra.gmra.mrb[6].mxu1 %v1641_v11 }
 0x590   :  { %1403 = vmatprep.mubr.msk.f32.mxu1 %vm1723_vm0, %v1724_v1  ;;  %1600 = vmatpush3.bf16.msra.mxu1 %v1599_v15  ;;  %v802_v1 = vld [vmem:[#allocation5 + $0x40] sm:$0xff] }
 0x591   :  { %1601 = vmatprep.subr.bf16.mxu1 %v1722_v0  ;;  %v1611_v25 = vpack.c.bf16 %v803_v24, %v802_v1 }
 0x594   :  { %1603 = vmatpush3.bf16.msra.mxu1 %v1602_v17 }
 0x595   :  { %1604 = vmatprep.subr.bf16.mxu1 %v1722_v0 }
 0x598   :  { %1606 = vmatpush3.bf16.msra.mxu1 %v1605_v20 }
 0x599   :  { %1607 = vmatprep.subr.bf16.mxu1 %v1722_v0 }
 0x59c   :  { %1609 = vmatpush3.bf16.msra.mxu1 %v1608_v23 }
 0x59d   :  { %1610 = vmatprep.subr.bf16.mxu1 %v1722_v0 }
 0x5a0   :  { %1612 = vmatpush3.bf16.msra.mxu1 %v1611_v25 }
 0x5a1   :  { %1613 = vmatprep.subr.bf16.mxu1 %v1722_v0 }
 0x5a4   :  { %1615 = vmatpush3.bf16.msra.mxu1 %v1614_v33 }
 0x5a5   :  { %1616 = vmatprep.subr.bf16.mxu1 %v1722_v0 }
 0x5a8   :  { %1618 = vmatpush3.bf16.msra.mxu1 %v1617_v36 }
 0x5a9   :  { %1619 = vmatprep.subr.bf16.mxu1 %v1722_v0 }
 0x5ac   :  { %1621 = vmatpush3.bf16.msra.mxu1 %v1620_v40 }
 0x662   :  { %v716_v27 = vpop.f32.mrb[6].mxu1 }
 0x663   :  { %v720_v28 = vadd.f32 %v716_v27, %v210_v26  ;;  %v1335_v29 = vpop.f32.mrb[7].mxu1 }
 0x665   :  { %1642 = vtanh.f32 %v720_v28 }
 0x66f   :  { %v1643_v30 = vpop.eup %1642 }
 0x670   :  { %1369 = vmatmul.mubr.f32.vlgmr.msra.gmra.mrb[14].mxu0 %v1643_v30 }
 0x743   :  { %v788_v42 = vpop.f32.mrb[14].mxu0 }
 0x744   :  { %v792_v43 = vadd.f32 %v788_v42, %v215_v41  ;;  %v1370_v44 = vpop.f32.mrb[15].mxu0 }
 0x746   :  { %1644 = vtanh.f32 %v792_v43 }
 0x750   :  { %v1645_v45 = vpop.eup %1644 }
 0x751   :  { %1404 = vmatmul.mubr.f32.vlgmr.msra.gmra.mrb[8].mxu1 %v1645_v45 }
 0x824   :  { %v883_v48 = vpop.f32.mrb[8].mxu1 }
 0x825   :  { %v884_v49 = vadd.f32 %v914_v46, %v883_v48  ;;  %v1405_v50 = vpop.f32.mrb[9].mxu1 }
 0x827   :  { %887 = vst [vmem:[#allocation7] sm:$0xff] %v884_v49 }
 0x828   :  { %1701 = shalt.err (!%p1698_p6)
}
 0x829   :  { %s1702_s3 = scalar_lea.hbm %s2037_s6, 128 }
 0x82a   :  { %p1703_p7 = scmp.ne.s32.totalorder %s2037_s6, %s1702_s3  ;;  %p1706_p8 = scmp.lt.u32.totalorder %s1702_s3, %s2037_s6 }
 0x82c   :  { %p1708_p9 = pnand %p1706_p8, %p1703_p7 }
 0x82e   :  { %1711 = shalt.err (!%p1708_p9)
}
 0x82f   :  { %897 = dma.vmem_to_hbm [thread:$0]  %s895_s17, 128, %s2037_s6, [#allocation4]  }
 0x830   :  { %1716 = dma.done.wait [#allocation4], 128  }
 0x831   :  { %1717 = vsyncadd [#allocation4], 4294967168 }
 0x832   :  { %901 = vsyncpa [#allocation3], 1 }
 0x833   :  { %902 = vsyncpa [#allocation6], 1 }
 0x834   :  { %903 = vsyncpa [#allocation4], 1 }

</bundles_post_ra>
